<compile_context>
chip_gen: v6e
topology: v6e:2x2x1
jax: 0.10.0
libtpu: 0.0.40
codegen_flags: <defaults>
</compile_context>

<pallas_src>
import numpy as np
import jax
import jax.numpy as jnp
from jax.experimental import pallas as pl
from jax.experimental.pallas import tpu as pltpu

_LANE = 128  # TPU lane width; fused head output is padded to a multiple of this.


def _round_up(x, m):
    return ((x + m - 1) // m) * m


def _mlp_decoder_kernel(x_ref, w1_ref, b1_ref, w2_ref, b2_ref, w3_ref, b3_ref,
                        wh_ref, bh_ref, out_ref):
    # Trunk: 3 x (Linear + ReLU). bf16 MXU inputs, f32 accumulation, f32 bias add.
    h = x_ref[...]  # already bf16 (pre-cast in the wrapper)
    h = jnp.maximum(
        jnp.dot(h, w1_ref[...], preferred_element_type=jnp.float32) + b1_ref[...], 0.0)
    h = jnp.maximum(
        jnp.dot(h.astype(jnp.bfloat16), w2_ref[...],
                preferred_element_type=jnp.float32) + b2_ref[...], 0.0)
    h = jnp.maximum(
        jnp.dot(h.astype(jnp.bfloat16), w3_ref[...],
                preferred_element_type=jnp.float32) + b3_ref[...], 0.0)
    # Fused heads: single lane-dense matmul over the 128-padded output width.
    y = (jnp.dot(h.astype(jnp.bfloat16), wh_ref[...],
                 preferred_element_type=jnp.float32) + bh_ref[...])
    out_ref[...] = y.astype(out_ref.dtype)


def init_mlp_decoder_params(key, input_dim, dense_units, mlp_layers, output_dims):
    """Deterministic init mimicking PyTorch Linear default (U[-1/sqrt(fan_in), +]).

    Weights are stored transposed w.r.t. PyTorch, i.e. (in_features, out_features).
    """
    params = {}
    dims = [input_dim] + [dense_units] * mlp_layers
    n_heads = len(output_dims)
    keys = jax.random.split(key, 2 * mlp_layers + 2 * n_heads)
    ki = 0
    for l in range(mlp_layers):
        fan_in = dims[l]
        bound = 1.0 / np.sqrt(fan_in)
        params[f"w{l + 1}"] = jax.random.uniform(
            keys[ki], (dims[l], dims[l + 1]), jnp.float32, -bound, bound); ki += 1
        params[f"b{l + 1}"] = jax.random.uniform(
            keys[ki], (1, dims[l + 1]), jnp.float32, -bound, bound); ki += 1
    bound = 1.0 / np.sqrt(dense_units)
    for i, od in enumerate(output_dims):
        params[f"head_{i}_w"] = jax.random.uniform(
            keys[ki], (dense_units, od), jnp.float32, -bound, bound); ki += 1
        params[f"head_{i}_b"] = jax.random.uniform(
            keys[ki], (1, od), jnp.float32, -bound, bound); ki += 1
    return params


def prepare_decoder_params(params, output_dims):
    """One-time prep, hoisted out of the forward path:
      * concatenate per-key head weights/biases into one fused head,
      * zero-pad the fused output width to a multiple of 128 lanes,
      * cast weights to bf16 (biases stay f32 for the f32 bias add).
    """
    n_heads = len(output_dims)
    total_out = int(sum(output_dims))
    total_pad = _round_up(total_out, _LANE)

    wh = jnp.concatenate([params[f"head_{i}_w"] for i in range(n_heads)], axis=1)
    bh = jnp.concatenate([params[f"head_{i}_b"] for i in range(n_heads)], axis=1)
    if total_pad != total_out:
        wh = jnp.pad(wh, ((0, 0), (0, total_pad - total_out)))
        bh = jnp.pad(bh, ((0, 0), (0, total_pad - total_out)))

    return {
        "w1": params["w1"].astype(jnp.bfloat16), "b1": params["b1"],
        "w2": params["w2"].astype(jnp.bfloat16), "b2": params["b2"],
        "w3": params["w3"].astype(jnp.bfloat16), "b3": params["b3"],
        "wh": wh.astype(jnp.bfloat16), "bh": bh,
    }


def _choose_batch_tiling(B, batch_tile):
    """Pick (TB, B_pad, n_tiles).

    - Pad B only to a multiple of 16 (bf16 sublane packing), not a full tile,
      so tiny batches don't burn 16x MXU work on zero rows.
    - Large batches use TB = batch_tile (default 512 amortizes the ~0.35us
      per-grid-step overhead on v6e/v7x; sweep 128-256 on v5e).
    - If everything fits one big tile (>=256 rows), split into two tiles so the
      "parallel" grid axis shards across both v7x TensorCores.
    """
    B_pad = _round_up(max(B, 1), 16)
    TB = min(_round_up(batch_tile, 16), B_pad)
    if B_pad <= TB and TB >= 256:
        TB = _round_up((TB + 1) // 2, 16)
    n_tiles = -(-B_pad // TB)
    B_pad = n_tiles * TB
    return TB, B_pad, n_tiles


def _estimate_vmem_bytes(TB, input_dim, dense, total_pad, out_itemsize):
    weights = 2 * (input_dim * dense + 2 * dense * dense + dense * total_pad)  # bf16, 1-buf
    biases = 4 * (3 * dense + total_pad)                                       # f32, 1-buf
    x_tiles = 2 * (TB * input_dim * 2)                                         # bf16, 2-buf
    out_tiles = 2 * (TB * total_pad * out_itemsize)                            # 2-buf
    h_scratch = TB * dense * (4 + 2)                                           # f32 + bf16 recast
    return weights + biases + x_tiles + out_tiles + h_scratch


def mlp_decoder_forward(x, fused, output_dims, decoder_keys,
                        batch_tile=512, out_dtype=jnp.float32):
    """Run the fused decoder kernel. `fused` comes from prepare_decoder_params.

    out_dtype=jnp.bfloat16 halves the output writeback DMA if downstream
    consumers tolerate bf16 reconstructions.
    """
    B, input_dim = x.shape
    dense = fused["w1"].shape[1]
    total_pad = fused["wh"].shape[1]

    # Pre-cast activations to bf16 (native MXU input; halves x DMA bytes).
    x = x.astype(jnp.bfloat16)

    TB, B_pad, n_tiles = _choose_batch_tiling(B, batch_tile)
    if B_pad != B:
        x = jnp.pad(x, ((0, B_pad - B), (0, 0)))

    def const_spec(shape):
        # Weights/biases: constant block index -> fetched once, VMEM-resident
        # across batch tiles; single-buffered to halve their VMEM footprint.
        # (Verify in the Mosaic dump that the weight DMAs issue only once; if a
        #  future lowering re-fetches per tile, drop pipeline_mode here.)
        return pl.BlockSpec(shape, lambda i: (0, 0),
                            pipeline_mode=pl.Buffered(buffer_count=1))

    # Right-sized scoped-VMEM limit: generous margin over the real footprint,
    # capped at 32 MiB so we never claim all of v7x's 64 MiB physical VMEM.
    out_itemsize = jnp.dtype(out_dtype).itemsize
    vmem_est = _estimate_vmem_bytes(TB, input_dim, dense, total_pad, out_itemsize)
    vmem_limit = int(min(32 * 1024 * 1024, 2 * vmem_est + 8 * 1024 * 1024))

    # Advisory cost estimate so XLA schedules/overlaps this call sensibly.
    flops = 2 * B_pad * (input_dim * dense + 2 * dense * dense + dense * total_pad)
    bytes_accessed = int(
        x.size * x.dtype.itemsize
        + sum(int(fused[k].size) * fused[k].dtype.itemsize
              for k in ("w1", "b1", "w2", "b2", "w3", "b3", "wh", "bh"))
        + B_pad * total_pad * out_itemsize)

    out = pl.pallas_call(
        _mlp_decoder_kernel,
        out_shape=jax.ShapeDtypeStruct((B_pad, total_pad), out_dtype),
        grid=(n_tiles,),
        in_specs=[
            pl.BlockSpec((TB, input_dim), lambda i: (i, 0)),
            const_spec(fused["w1"].shape), const_spec(fused["b1"].shape),
            const_spec(fused["w2"].shape), const_spec(fused["b2"].shape),
            const_spec(fused["w3"].shape), const_spec(fused["b3"].shape),
            const_spec(fused["wh"].shape), const_spec(fused["bh"].shape),
        ],
        out_specs=pl.BlockSpec((TB, total_pad), lambda i: (i, 0)),
        compiler_params=pltpu.CompilerParams(
            dimension_semantics=("parallel",),
            vmem_limit_bytes=vmem_limit),
        cost_estimate=pl.CostEstimate(
            flops=flops, transcendentals=0, bytes_accessed=bytes_accessed),
    )(x, fused["w1"], fused["b1"], fused["w2"], fused["b2"],
      fused["w3"], fused["b3"], fused["wh"], fused["bh"])

    # Split the fused (lane-padded) head output back into the per-key dict.
    reconstructed_obs = {}
    off = 0
    for k, od in zip(decoder_keys, output_dims):
        reconstructed_obs[k] = out[:B, off:off + od]
        off += od
    return reconstructed_obs


def _reference_forward(x, params, output_dims, decoder_keys):
    """Pure-f32 reference matching the PyTorch module semantics."""
    h = x
    for l in range(3):
        h = jnp.maximum(h @ params[f"w{l + 1}"] + params[f"b{l + 1}"], 0.0)
    return {
        k: h @ params[f"head_{i}_w"] + params[f"head_{i}_b"]
        for i, k in enumerate(decoder_keys)
    }


def _reference_forward_bf16(x, fused, output_dims, decoder_keys):
    """Reference mirroring the kernel arithmetic (bf16 MXU inputs, f32 accum)."""
    h = x.astype(jnp.bfloat16)
    for l in (1, 2, 3):
        pre = (jnp.dot(h, fused[f"w{l}"], preferred_element_type=jnp.float32)
               + fused[f"b{l}"])
        h = jnp.maximum(pre, 0.0).astype(jnp.bfloat16)
    full = jnp.dot(h, fused["wh"], preferred_element_type=jnp.float32) + fused["bh"]
    out, off = {}, 0
    for k, od in zip(decoder_keys, output_dims):
        out[k] = full[:, off:off + od]
        off += od
    return out


if __name__ == "__main__":
    # Small, module-consistent shapes.
    batch = 8
    input_dim = 32          # latent / feature input to the decoder
    dense_units = 128       # (module default is 1024; small here)
    mlp_layers = 3
    output_dims = (16, 8)   # flat obs reconstruction sizes per key
    decoder_keys = ("vector_obs", "proprio")

    root = jax.random.PRNGKey(0)
    pkey, xkey = jax.random.split(root)
    params = init_mlp_decoder_params(pkey, input_dim, dense_units, mlp_layers, output_dims)
    fused = prepare_decoder_params(params, output_dims)   # hoisted, one-time
    x = jax.random.normal(xkey, (batch, input_dim), jnp.float32)

    out = mlp_decoder_forward(x, fused, output_dims, decoder_keys)
    out = jax.tree_util.tree_map(jax.block_until_ready, out)

    # Tight check vs a reference that mirrors the kernel's bf16/f32 arithmetic,
    # plus a looser check vs the pure-f32 module semantics (bf16 weight rounding).
    ref_bf16 = _reference_forward_bf16(x, fused, output_dims, decoder_keys)
    ref_f32 = _reference_forward(x, params, output_dims, decoder_keys)
    for k in decoder_keys:
        assert out[k].shape == ref_f32[k].shape
        np.testing.assert_allclose(np.asarray(out[k]), np.asarray(ref_bf16[k]),
                                   rtol=1e-3, atol=1e-3)
        np.testing.assert_allclose(np.asarray(out[k]), np.asarray(ref_f32[k]),
                                   rtol=3e-2, atol=3e-2)

    print("KERNEL_OK")
</pallas_src>

<mosaic_0001>
module attributes {stable_mosaic.version = 11 : i64} {
  func.func @_mlp_decoder_kernel(%arg0: i32, %arg1: memref<16x32xbf16, #tpu.memory_space<vmem>>, %arg2: memref<32x128xbf16, #tpu.memory_space<vmem>>, %arg3: memref<1x128xf32, #tpu.memory_space<vmem>>, %arg4: memref<128x128xbf16, #tpu.memory_space<vmem>>, %arg5: memref<1x128xf32, #tpu.memory_space<vmem>>, %arg6: memref<128x128xbf16, #tpu.memory_space<vmem>>, %arg7: memref<1x128xf32, #tpu.memory_space<vmem>>, %arg8: memref<128x128xbf16, #tpu.memory_space<vmem>>, %arg9: memref<1x128xf32, #tpu.memory_space<vmem>>, %arg10: memref<16x128xf32, #tpu.memory_space<vmem>>) attributes {dimension_semantics = [#tpu.dimension_semantics<parallel>], iteration_bounds = array<i64: 1>, scalar_prefetch = 0 : i64, scratch_operands = 0 : i64, tpu.core_type = #tpu.core_type<tc>, window_params = [{transform_indices = @transform_0, window_bounds = array<i64: 16, 32>}, {pipeline_mode = #tpu.pipeline_mode<synchronous>, transform_indices = @transform_1, window_bounds = array<i64: 32, 128>}, {pipeline_mode = #tpu.pipeline_mode<synchronous>, transform_indices = @transform_2, window_bounds = array<i64: 1, 128>}, {pipeline_mode = #tpu.pipeline_mode<synchronous>, transform_indices = @transform_3, window_bounds = array<i64: 128, 128>}, {pipeline_mode = #tpu.pipeline_mode<synchronous>, transform_indices = @transform_4, window_bounds = array<i64: 1, 128>}, {pipeline_mode = #tpu.pipeline_mode<synchronous>, transform_indices = @transform_5, window_bounds = array<i64: 128, 128>}, {pipeline_mode = #tpu.pipeline_mode<synchronous>, transform_indices = @transform_6, window_bounds = array<i64: 1, 128>}, {pipeline_mode = #tpu.pipeline_mode<synchronous>, transform_indices = @transform_7, window_bounds = array<i64: 128, 128>}, {pipeline_mode = #tpu.pipeline_mode<synchronous>, transform_indices = @transform_8, window_bounds = array<i64: 1, 128>}, {transform_indices = @transform_9, window_bounds = array<i64: 16, 128>}]} {
    %c0 = arith.constant 0 : index
    %c0_0 = arith.constant 0 : index
    %0 = vector.load %arg1[%c0, %c0_0] : memref<16x32xbf16, #tpu.memory_space<vmem>>, vector<16x32xbf16>
    %c0_1 = arith.constant 0 : index
    %c0_2 = arith.constant 0 : index
    %1 = vector.load %arg2[%c0_1, %c0_2] : memref<32x128xbf16, #tpu.memory_space<vmem>>, vector<32x128xbf16>
    %cst = arith.constant dense<0.000000e+00> : vector<16x128xf32>
    %2 = tpu.matmul %0, %1, %cst {dimension_numbers = #tpu.dot_dimension_numbers<[1], [0], [0], [1], [0, 0, 1, 1], [], []>} : vector<16x32xbf16>, vector<32x128xbf16>, vector<16x128xf32> -> vector<16x128xf32>
    %c0_3 = arith.constant 0 : index
    %c0_4 = arith.constant 0 : index
    %3 = vector.load %arg3[%c0_3, %c0_4] : memref<1x128xf32, #tpu.memory_space<vmem>>, vector<1x128xf32>
    %4 = vector.broadcast %3 : vector<1x128xf32> to vector<16x128xf32>
    %5 = arith.addf %2, %4 : vector<16x128xf32>
    %cst_5 = arith.constant 0.000000e+00 : f32
    %6 = vector.broadcast %cst_5 : f32 to vector<16x128xf32>
    %7 = arith.maximumf %5, %6 : vector<16x128xf32>
    %8 = arith.truncf %7 : vector<16x128xf32> to vector<16x128xbf16>
    %c0_6 = arith.constant 0 : index
    %c0_7 = arith.constant 0 : index
    %9 = vector.load %arg4[%c0_6, %c0_7] : memref<128x128xbf16, #tpu.memory_space<vmem>>, vector<128x128xbf16>
    %cst_8 = arith.constant dense<0.000000e+00> : vector<16x128xf32>
    %10 = tpu.matmul %8, %9, %cst_8 {dimension_numbers = #tpu.dot_dimension_numbers<[1], [0], [0], [1], [0, 0, 1, 1], [], []>} : vector<16x128xbf16>, vector<128x128xbf16>, vector<16x128xf32> -> vector<16x128xf32>
    %c0_9 = arith.constant 0 : index
    %c0_10 = arith.constant 0 : index
    %11 = vector.load %arg5[%c0_9, %c0_10] : memref<1x128xf32, #tpu.memory_space<vmem>>, vector<1x128xf32>
    %12 = vector.broadcast %11 : vector<1x128xf32> to vector<16x128xf32>
    %13 = arith.addf %10, %12 : vector<16x128xf32>
    %cst_11 = arith.constant 0.000000e+00 : f32
    %14 = vector.broadcast %cst_11 : f32 to vector<16x128xf32>
    %15 = arith.maximumf %13, %14 : vector<16x128xf32>
    %16 = arith.truncf %15 : vector<16x128xf32> to vector<16x128xbf16>
    %c0_12 = arith.constant 0 : index
    %c0_13 = arith.constant 0 : index
    %17 = vector.load %arg6[%c0_12, %c0_13] : memref<128x128xbf16, #tpu.memory_space<vmem>>, vector<128x128xbf16>
    %cst_14 = arith.constant dense<0.000000e+00> : vector<16x128xf32>
    %18 = tpu.matmul %16, %17, %cst_14 {dimension_numbers = #tpu.dot_dimension_numbers<[1], [0], [0], [1], [0, 0, 1, 1], [], []>} : vector<16x128xbf16>, vector<128x128xbf16>, vector<16x128xf32> -> vector<16x128xf32>
    %c0_15 = arith.constant 0 : index
    %c0_16 = arith.constant 0 : index
    %19 = vector.load %arg7[%c0_15, %c0_16] : memref<1x128xf32, #tpu.memory_space<vmem>>, vector<1x128xf32>
    %20 = vector.broadcast %19 : vector<1x128xf32> to vector<16x128xf32>
    %21 = arith.addf %18, %20 : vector<16x128xf32>
    %cst_17 = arith.constant 0.000000e+00 : f32
    %22 = vector.broadcast %cst_17 : f32 to vector<16x128xf32>
    %23 = arith.maximumf %21, %22 : vector<16x128xf32>
    %24 = arith.truncf %23 : vector<16x128xf32> to vector<16x128xbf16>
    %c0_18 = arith.constant 0 : index
    %c0_19 = arith.constant 0 : index
    %25 = vector.load %arg8[%c0_18, %c0_19] : memref<128x128xbf16, #tpu.memory_space<vmem>>, vector<128x128xbf16>
    %cst_20 = arith.constant dense<0.000000e+00> : vector<16x128xf32>
    %26 = tpu.matmul %24, %25, %cst_20 {dimension_numbers = #tpu.dot_dimension_numbers<[1], [0], [0], [1], [0, 0, 1, 1], [], []>} : vector<16x128xbf16>, vector<128x128xbf16>, vector<16x128xf32> -> vector<16x128xf32>
    %c0_21 = arith.constant 0 : index
    %c0_22 = arith.constant 0 : index
    %27 = vector.load %arg9[%c0_21, %c0_22] : memref<1x128xf32, #tpu.memory_space<vmem>>, vector<1x128xf32>
    %28 = vector.broadcast %27 : vector<1x128xf32> to vector<16x128xf32>
    %29 = arith.addf %26, %28 : vector<16x128xf32>
    %c0_23 = arith.constant 0 : index
    %c0_24 = arith.constant 0 : index
    %30 = vector.load %arg10[%c0_23, %c0_24] : memref<16x128xf32, #tpu.memory_space<vmem>>, vector<16x128xf32>
    tpu.vector_store %arg10[%c0_23, %c0_24], %29 {strides = array<i32>} : memref<16x128xf32, #tpu.memory_space<vmem>>, vector<16x128xf32>,
    return
  }
  func.func @transform_0(%arg0: i32) -> (i32, i32) {
    %c0_i32 = arith.constant 0 : i32
    %c0_i32_0 = arith.constant 0 : i32
    return %arg0, %c0_i32 : i32, i32
  }
  func.func @transform_1(%arg0: i32) -> (i32, i32) {
    %c0_i32 = arith.constant 0 : i32
    %c0_i32_0 = arith.constant 0 : i32
    %c0_i32_1 = arith.constant 0 : i32
    return %c0_i32, %c0_i32_0 : i32, i32
  }
  func.func @transform_2(%arg0: i32) -> (i32, i32) {
    %c0_i32 = arith.constant 0 : i32
    %c0_i32_0 = arith.constant 0 : i32
    %c0_i32_1 = arith.constant 0 : i32
    return %c0_i32, %c0_i32_0 : i32, i32
  }
  func.func @transform_3(%arg0: i32) -> (i32, i32) {
    %c0_i32 = arith.constant 0 : i32
    %c0_i32_0 = arith.constant 0 : i32
    %c0_i32_1 = arith.constant 0 : i32
    return %c0_i32, %c0_i32_0 : i32, i32
  }
  func.func @transform_4(%arg0: i32) -> (i32, i32) {
    %c0_i32 = arith.constant 0 : i32
    %c0_i32_0 = arith.constant 0 : i32
    %c0_i32_1 = arith.constant 0 : i32
    return %c0_i32, %c0_i32_0 : i32, i32
  }
  func.func @transform_5(%arg0: i32) -> (i32, i32) {
    %c0_i32 = arith.constant 0 : i32
    %c0_i32_0 = arith.constant 0 : i32
    %c0_i32_1 = arith.constant 0 : i32
    return %c0_i32, %c0_i32_0 : i32, i32
  }
  func.func @transform_6(%arg0: i32) -> (i32, i32) {
    %c0_i32 = arith.constant 0 : i32
    %c0_i32_0 = arith.constant 0 : i32
    %c0_i32_1 = arith.constant 0 : i32
    return %c0_i32, %c0_i32_0 : i32, i32
  }
  func.func @transform_7(%arg0: i32) -> (i32, i32) {
    %c0_i32 = arith.constant 0 : i32
    %c0_i32_0 = arith.constant 0 : i32
    %c0_i32_1 = arith.constant 0 : i32
    return %c0_i32, %c0_i32_0 : i32, i32
  }
  func.func @transform_8(%arg0: i32) -> (i32, i32) {
    %c0_i32 = arith.constant 0 : i32
    %c0_i32_0 = arith.constant 0 : i32
    %c0_i32_1 = arith.constant 0 : i32
    return %c0_i32, %c0_i32_0 : i32, i32
  }
  func.func @transform_9(%arg0: i32) -> (i32, i32) {
    %c0_i32 = arith.constant 0 : i32
    %c0_i32_0 = arith.constant 0 : i32
    return %arg0, %c0_i32 : i32, i32
  }
}

</mosaic_0001>

<bundles_post_ra>
// kernel: tpu_custom_call.1
= control target key start
LH: loop header
LB: loop body
LE: loop exit
PB: predicated region body
PF: predicated region fallthrough
CT: control target
= control target key end

     0   :  { %14 = vsyncpa [#allocation3], 0  ;;  %s981_s0 = inlined_call_operand.hbm [shape: bf16[16,32], index: 0, kind: input, shape index: {}]   ;;  %s982_s1 = inlined_call_operand.hbm [shape: bf16[32,128], index: 1, kind: input, shape index: {}]   ;;  %s983_s2 = inlined_call_operand.vmem [shape: f32[1,128], index: 2, kind: input, shape index: {}]   ;;  %s984_s3 = inlined_call_operand.hbm [shape: bf16[128,128], index: 3, kind: input, shape index: {}]   ;;  %s985_s4 = inlined_call_operand.vmem [shape: f32[1,128], index: 4, kind: input, shape index: {}]   ;;  %s986_s5 = inlined_call_operand.hbm [shape: bf16[128,128], index: 5, kind: input, shape index: {}]   ;;  %s987_s6 = inlined_call_operand.vmem [shape: f32[1,128], index: 6, kind: input, shape index: {}]   ;;  %s988_s7 = inlined_call_operand.hbm [shape: bf16[128,128], index: 7, kind: input, shape index: {}]   ;;  %s989_s8 = inlined_call_operand.vmem [shape: f32[1,128], index: 8, kind: input, shape index: {}]   ;;  %s990_s9 = inlined_call_operand.hbm [shape: f32[16,128], index: 9, kind: output, shape index: {}]  }
   0x1   :  { %15 = vsyncpa [#allocation6], 0 }
   0x2   :  { %16 = vsyncpa [#allocation9], 0 }
   0x3   :  { %17 = vsyncpa [#allocation4], 0  ;;  %s840_s30 = smov [#allocation5]   ;;  %s841_s11 = smov [#allocation8]  }
   0x4   :  { %s35_s10 = sshll.u32 %s840_s30, 4  ;;  %s63_s12 = sshll.u32 %s841_s11, 4  ;;  %s36_s10 = int_to_ptr.vmem [resolvable:$true] %s35_s10  ;;  %s64_s12 = int_to_ptr.vmem [resolvable:$true] %s63_s12 }
   0x5   :  { %s720_s13 = scalar_lea.vmem %s36_s10, 256  ;;  %p725_p1 = scmp.lt.s32.totalorder %s36_s10, %s36_s10 }
   0x6   :  { %p721_p0 = scmp.ne.s32.totalorder %s36_s10, %s720_s13  ;;  %p726_p2 = scmp.lt.s32.totalorder %s720_s13, %s720_s13 }
   0x8   :  { %p727_p3 = por %p726_p2, %p725_p1 }
   0xa   :  { %p728_p4 = pnand %p727_p3, %p721_p0 }
   0xc   :  { %731 = shalt.err (!%p728_p4)
}
   0xd   :  { %s842_s14 = smov 64   ;;  %s843_s15 = smov 4  }
   0xe   :  { %41 = dma.hbm_to_vmem [thread:$0]  %s982_s1, 256, %s36_s10, [#allocation6], %s842_s14, %s842_s14, %s843_s15  }
   0xf   :  { %s740_s18 = scalar_lea.vmem %s64_s12, 1024  ;;  %p745_p6 = scmp.lt.s32.totalorder %s64_s12, %s64_s12 }
  0x10   :  { %p741_p5 = scmp.ne.s32.totalorder %s64_s12, %s740_s18  ;;  %p746_p7 = scmp.lt.s32.totalorder %s740_s18, %s740_s18 }
  0x12   :  { %p747_p8 = por %p746_p7, %p745_p6 }
  0x14   :  { %p748_p9 = pnand %p747_p8, %p741_p5 }
  0x16   :  { %751 = shalt.err (!%p748_p9)
}
  0x17   :  { %69 = dma.hbm_to_vmem [thread:$0]  %s986_s5, 1024, %s64_s12, [#allocation9], %s842_s14, %s842_s14, %s843_s15  }
  0x18   :  { %s844_s21 = smov [#allocation2]   ;;  %s845_s23 = smov [#allocation7]  }
  0x19   :  { %s23_s22 = sshll.u32 %s844_s21, 4  ;;  %s49_s24 = sshll.u32 %s845_s23, 4  ;;  %s24_s22 = int_to_ptr.vmem [resolvable:$true] %s23_s22  ;;  %s50_s24 = int_to_ptr.vmem [resolvable:$true] %s49_s24 }
  0x1a   :  { %s760_s1 = scalar_lea.vmem %s24_s22, 128  ;;  %p765_p11 = scmp.lt.s32.totalorder %s24_s22, %s24_s22 }
  0x1b   :  { %p761_p10 = scmp.ne.s32.totalorder %s24_s22, %s760_s1  ;;  %p766_p12 = scmp.lt.s32.totalorder %s760_s1, %s760_s1 }
  0x1d   :  { %p767_p13 = por %p766_p12, %p765_p11 }
  0x1f   :  { %p768_p0 = pnand %p767_p13, %p761_p10 }
  0x21   :  { %771 = shalt.err (!%p768_p0)
}
  0x22   :  { %29 = dma.hbm_to_vmem [thread:$0]  %s981_s0, 128, %s24_s22, [#allocation3], %s842_s14, %s842_s14, %s843_s15  }
  0x23   :  { %s780_s5 = scalar_lea.vmem %s50_s24, 1024  ;;  %p785_p2 = scmp.lt.s32.totalorder %s50_s24, %s50_s24 }
  0x24   :  { %p781_p1 = scmp.ne.s32.totalorder %s50_s24, %s780_s5  ;;  %p786_p3 = scmp.lt.s32.totalorder %s780_s5, %s780_s5 }
  0x26   :  { %p787_p4 = por %p786_p3, %p785_p2 }
  0x28   :  { %p788_p5 = pnand %p787_p4, %p781_p1 }
  0x2a   :  { %791 = shalt.err (!%p788_p5)
}
  0x2b   :  { %55 = dma.hbm_to_vmem [thread:$0]  %s984_s3, 1024, %s50_s24, [#allocation6], %s842_s14, %s842_s14, %s843_s15  }
  0x2c   :  { %s846_s29 = smov [#allocation10]  }
  0x2d   :  { %s77_s30 = sshll.u32 %s846_s29, 4  ;;  %s78_s30 = int_to_ptr.vmem [resolvable:$true] %s77_s30 }
  0x2e   :  { %s800_s10 = scalar_lea.vmem %s78_s30, 1024  ;;  %p805_p7 = scmp.lt.s32.totalorder %s78_s30, %s78_s30 }
  0x2f   :  { %p801_p6 = scmp.ne.s32.totalorder %s78_s30, %s800_s10  ;;  %p806_p8 = scmp.lt.s32.totalorder %s800_s10, %s800_s10 }
  0x31   :  { %p807_p9 = por %p806_p8, %p805_p7 }
  0x33   :  { %p808_p10 = pnand %p807_p9, %p801_p6 }
  0x35   :  { %811 = shalt.err (!%p808_p10)
}
  0x36   :  { %83 = dma.hbm_to_vmem [thread:$0]  %s988_s7, 1024, %s78_s30, [#allocation9], %s842_s14, %s842_s14, %s843_s15  }
  0x37   :  { %832 = dma.done.wait [#allocation3], 128  }
  0x38   :  { %833 = vsyncadd [#allocation3], 4294967168 }
  0x39   :  { %834 = dma.done.wait [#allocation6], 1280  }
  0x3a   :  { %835 = vsyncadd [#allocation6], 4294966016 }
  0x3b   :  { %836 = dma.done.wait [#allocation9], 2048  }
  0x3c   :  { %837 = vsyncadd [#allocation9], 4294965248  ;;  %v847_v0 = vmov 0.0   ;;  %vm848_vm0 = vmmov 0   ;;  %v685_v1 = vld [vmem:[#allocation5 + $0x8] sm:$0xff]   ;;  %v686_v2 = vld [vmem:[#allocation5] sm:$0xff]  }
  0x3d   :  { %605 = vmatprep.subr.bf16.mxu0 %v847_v0  ;;  %609 = vmatprep.mubr.msk.bf16.mxu0 %vm848_vm0, %v847_v0  ;;  %v688_v3 = vld [vmem:[#allocation7 + $0x38] sm:$0xff]   ;;  %v687_v4 = vld [vmem:[#allocation2] sm:$0xff]   ;;  %v689_v5 = vld [vmem:[#allocation7 + $0x30] sm:$0xff]   ;;  %vm132_vm1 = vcmask 261120   ;;  %s849_s16 = smov [#allocation11]  }
  0x3e   :  { %613 = vmatprep.subr.bf16.mxu1 %v847_v0  ;;  %629 = vmatprep.mubr.msk.bf16.mxu1 %vm848_vm0, %v847_v0  ;;  %v690_v6 = vld [vmem:[#allocation7 + $0x28] sm:$0xff]   ;;  %v691_v7 = vld [vmem:[#allocation7 + $0x20] sm:$0xff]   ;;  %v692_v8 = vld [vmem:[#allocation7 + $0x18] sm:$0xff]   ;;  %s529_s17 = sshll.u32 %s849_s16, 4  ;;  %s530_s17 = int_to_ptr.vmem [resolvable:$true] %s529_s17 }
  0x3f   :  { %606 = vmatpush3.bf16.msra.mxu0 %v685_v1  ;;  %614 = vmatpush3.bf16.msra.mxu1 %v688_v3  ;;  %v693_v9 = vld [vmem:[#allocation7 + $0x10] sm:$0xff]   ;;  %v694_v10 = vld [vmem:[#allocation7 + $0x8] sm:$0xff]   ;;  %v695_v11 = vld [vmem:[#allocation7] sm:$0xff]   ;;  %p817_p12 = scmp.lt.s32.totalorder %s530_s17, %s530_s17 }
  0x40   :  { %607 = vmatprep.subr.bf16.mxu0 %v847_v0  ;;  %615 = vmatprep.subr.bf16.mxu1 %v847_v0  ;;  %v696_v12 = vld [vmem:[#allocation8 + $0x38] sm:$0xff]   ;;  %v697_v13 = vld [vmem:[#allocation8 + $0x30] sm:$0xff]   ;;  %v698_v14 = vld [vmem:[#allocation8 + $0x28] sm:$0xff]  }
  0x41   :  { %v699_v15 = vld [vmem:[#allocation8 + $0x20] sm:$0xff]   ;;  %v700_v16 = vld [vmem:[#allocation8 + $0x18] sm:$0xff]   ;;  %v543_v17 = vld [vmem:[%s983_s2] ss:$0 sm:$0xff] }
  0x42   :  { %v701_v27 = vld [vmem:[#allocation8 + $0x10] sm:$0xff]   ;;  %v702_v28 = vld [vmem:[#allocation8 + $0x8] sm:$0xff]   ;;  %v703_v29 = vld [vmem:[#allocation8] sm:$0xff]  }
  0x43   :  { %608 = vmatpush3.bf16.msra.mxu0 %v686_v2  ;;  %616 = vmatpush3.bf16.msra.mxu1 %v689_v5  ;;  %v704_v30 = vld [vmem:[#allocation10 + $0x38] sm:$0xff]   ;;  %v705_v31 = vld [vmem:[#allocation10 + $0x30] sm:$0xff]   ;;  %v706_v32 = vld [vmem:[#allocation10 + $0x28] sm:$0xff]  }
  0x44   :  { %633 = vmatprep.subr.bf16.mxu0 %v847_v0  ;;  %617 = vmatprep.subr.bf16.mxu1 %v847_v0  ;;  %v707_v33 = vld [vmem:[#allocation10 + $0x20] sm:$0xff]   ;;  %v708_v34 = vld [vmem:[#allocation10 + $0x18] sm:$0xff]   ;;  %v548_v35 = vld [vmem:[%s985_s4] ss:$0 sm:$0xff] }
  0x45   :  { %v709_v45 = vld [vmem:[#allocation10 + $0x10] sm:$0xff]   ;;  %v710_v46 = vld [vmem:[#allocation10 + $0x8] sm:$0xff]   ;;  %v711_v47 = vld [vmem:[#allocation10] sm:$0xff]  }
  0x46   :  { %610 = vmatmul.mubr.msk.bf16.vlgmr.msra.gmra.mxu0 %vm132_vm1, %v687_v4  ;;  %v557_v48 = vld [vmem:[%s987_s6] ss:$0 sm:$0xff]  ;;  %s812_s6 = scalar_lea.vmem %s530_s17, 256 }
  0x47   :  { %649 = vmatprep.mubr.msk.bf16.mxu0 %vm848_vm0, %v847_v0  ;;  %618 = vmatpush3.bf16.msra.mxu1 %v690_v6  ;;  %v566_v58 = vld [vmem:[%s989_s8] ss:$0 sm:$0xff]  ;;  %p813_p11 = scmp.ne.s32.totalorder %s530_s17, %s812_s6  ;;  %p818_p13 = scmp.lt.s32.totalorder %s812_s6, %s812_s6 }
  0x48   :  { %619 = vmatprep.subr.bf16.mxu1 %v847_v0  ;;  %634 = vmatpush3.bf16.msra.mxu0 %v696_v12 }
  0x49   :  { %635 = vmatprep.subr.bf16.mxu0 %v847_v0  ;;  %p819_p0 = por %p818_p13, %p817_p12 }
  0x4b   :  { %620 = vmatpush3.bf16.msra.mxu1 %v691_v7  ;;  %p820_p1 = pnand %p819_p0, %p813_p11 }
  0x4c   :  { %621 = vmatprep.subr.bf16.mxu1 %v847_v0  ;;  %636 = vmatpush3.bf16.msra.mxu0 %v697_v13 }
  0x4d   :  { %637 = vmatprep.subr.bf16.mxu0 %v847_v0 }
  0x4f   :  { %622 = vmatpush3.bf16.msra.mxu1 %v692_v8 }
  0x50   :  { %623 = vmatprep.subr.bf16.mxu1 %v847_v0  ;;  %638 = vmatpush3.bf16.msra.mxu0 %v698_v14 }
  0x51   :  { %639 = vmatprep.subr.bf16.mxu0 %v847_v0 }
  0x53   :  { %624 = vmatpush3.bf16.msra.mxu1 %v693_v9 }
  0x54   :  { %625 = vmatprep.subr.bf16.mxu1 %v847_v0  ;;  %640 = vmatpush3.bf16.msra.mxu0 %v699_v15 }
  0x55   :  { %641 = vmatprep.subr.bf16.mxu0 %v847_v0 }
  0x57   :  { %626 = vmatpush3.bf16.msra.mxu1 %v694_v10 }
  0x58   :  { %627 = vmatprep.subr.bf16.mxu1 %v847_v0  ;;  %642 = vmatpush3.bf16.msra.mxu0 %v700_v16 }
  0x59   :  { %643 = vmatprep.subr.bf16.mxu0 %v847_v0 }
  0x5b   :  { %628 = vmatpush3.bf16.msra.mxu1 %v695_v11 }
  0x5c   :  { %653 = vmatprep.subr.bf16.mxu1 %v847_v0  ;;  %644 = vmatpush3.bf16.msra.mxu0 %v701_v27 }
  0x5d   :  { %645 = vmatprep.subr.bf16.mxu0 %v847_v0 }
  0x60   :  { %646 = vmatpush3.bf16.msra.mxu0 %v702_v28 }
  0x61   :  { %647 = vmatprep.subr.bf16.mxu0 %v847_v0 }
  0x64   :  { %648 = vmatpush3.bf16.msra.mxu0 %v703_v29 }
 0x106   :  { %v170_v18 = vpop.f32.mrf.mxu0 }
 0x107   :  { %v171_v20 = vadd.f32 %v543_v17, %v170_v18 }
 0x108   :  { %v611_v19 = vpop.f32.mrf.mxu0 }
 0x109   :  { %v177_v24 = vmax.f32 %v171_v20, 0.0 }
 0x10a   :  { %v173_v21 = vpop.f32.mrf.mxu0 }
 0x10b   :  { %v174_v22 = vadd.f32 %v543_v17, %v173_v21 }
 0x10c   :  { %v612_v23 = vpop.f32.mrf.mxu0 }
 0x10d   :  { %v178_v25 = vmax.f32 %v174_v22, 0.0 }
 0x10f   :  { %v179_v26 = vpack.c.bf16 %v178_v25, %v177_v24 }
 0x111   :  { %630 = vmatmul.mubr.bf16.vlgmr.msra.gmra.mxu1 %v179_v26 }
 0x112   :  { %669 = vmatprep.mubr.msk.bf16.mxu1 %vm848_vm0, %v847_v0  ;;  %654 = vmatpush3.bf16.msra.mxu1 %v704_v30 }
 0x113   :  { %655 = vmatprep.subr.bf16.mxu1 %v847_v0 }
 0x116   :  { %656 = vmatpush3.bf16.msra.mxu1 %v705_v31 }
 0x117   :  { %657 = vmatprep.subr.bf16.mxu1 %v847_v0 }
 0x11a   :  { %658 = vmatpush3.bf16.msra.mxu1 %v706_v32 }
 0x11b   :  { %659 = vmatprep.subr.bf16.mxu1 %v847_v0 }
 0x11e   :  { %660 = vmatpush3.bf16.msra.mxu1 %v707_v33 }
 0x11f   :  { %661 = vmatprep.subr.bf16.mxu1 %v847_v0 }
 0x122   :  { %662 = vmatpush3.bf16.msra.mxu1 %v708_v34 }
 0x123   :  { %663 = vmatprep.subr.bf16.mxu1 %v847_v0 }
 0x126   :  { %664 = vmatpush3.bf16.msra.mxu1 %v709_v45 }
 0x127   :  { %665 = vmatprep.subr.bf16.mxu1 %v847_v0 }
 0x12a   :  { %666 = vmatpush3.bf16.msra.mxu1 %v710_v46 }
 0x12b   :  { %667 = vmatprep.subr.bf16.mxu1 %v847_v0 }
 0x12e   :  { %668 = vmatpush3.bf16.msra.mxu1 %v711_v47 }
 0x1d1   :  { %v285_v36 = vpop.f32.mrf.mxu1 }
 0x1d2   :  { %v286_v38 = vadd.f32 %v548_v35, %v285_v36 }
 0x1d3   :  { %v631_v37 = vpop.f32.mrf.mxu1 }
 0x1d4   :  { %v292_v42 = vmax.f32 %v286_v38, 0.0 }
 0x1d5   :  { %v288_v39 = vpop.f32.mrf.mxu1 }
 0x1d6   :  { %v289_v40 = vadd.f32 %v548_v35, %v288_v39 }
 0x1d7   :  { %v632_v41 = vpop.f32.mrf.mxu1 }
 0x1d8   :  { %v293_v43 = vmax.f32 %v289_v40, 0.0 }
 0x1da   :  { %v294_v44 = vpack.c.bf16 %v293_v43, %v292_v42 }
 0x1dc   :  { %650 = vmatmul.mubr.bf16.vlgmr.msra.gmra.mxu0 %v294_v44 }
 0x29c   :  { %v400_v49 = vpop.f32.mrf.mxu0 }
 0x29d   :  { %v401_v51 = vadd.f32 %v557_v48, %v400_v49 }
 0x29e   :  { %v651_v50 = vpop.f32.mrf.mxu0 }
 0x29f   :  { %v407_v55 = vmax.f32 %v401_v51, 0.0 }
 0x2a0   :  { %v403_v52 = vpop.f32.mrf.mxu0 }
 0x2a1   :  { %v404_v53 = vadd.f32 %v557_v48, %v403_v52 }
 0x2a2   :  { %v652_v54 = vpop.f32.mrf.mxu0 }
 0x2a3   :  { %v408_v56 = vmax.f32 %v404_v53, 0.0 }
 0x2a5   :  { %v409_v57 = vpack.c.bf16 %v408_v56, %v407_v55 }
 0x2a7   :  { %670 = vmatmul.mubr.bf16.vlgmr.msra.gmra.mxu1 %v409_v57 }
 0x367   :  { %v515_v59 = vpop.f32.mrf.mxu1 }
 0x368   :  { %v516_v60 = vadd.f32 %v566_v58, %v515_v59 }
 0x369   :  { %v671_v61 = vpop.f32.mrf.mxu1 }
 0x36a   :  { %522 = vst [vmem:[#allocation11] sm:$0xff] %v516_v60 }
 0x36b   :  { %v518_v62 = vpop.f32.mrf.mxu1 }
 0x36c   :  { %v519_v63 = vadd.f32 %v566_v58, %v518_v62 }
 0x36d   :  { %v672_v0 = vpop.f32.mrf.mxu1 }
 0x36e   :  { %523 = vst [vmem:[#allocation11 + $0x8] sm:$0xff] %v519_v63 }
 0x36f   :  { %823 = shalt.err (!%p820_p1)
}
 0x370   :  { %s850_s18 = smov 128   ;;  %s851_s8 = smov 8  }
 0x371   :  { %535 = dma.vmem_to_hbm [thread:$0]  %s530_s17, 256, %s990_s9, [#allocation4], %s850_s18, %s850_s18, %s851_s8  }
 0x372   :  { %838 = dma.done.wait [#allocation4], 256  }
 0x373   :  { %839 = vsyncadd [#allocation4], 4294967040 }
 0x374   :  { %539 = vsyncpa [#allocation3], 1 }
 0x375   :  { %540 = vsyncpa [#allocation6], 1 }
 0x376   :  { %541 = vsyncpa [#allocation9], 1 }
 0x377   :  { %542 = vsyncpa [#allocation4], 1 }

</bundles_post_ra>
